<compile_context>
chip_gen: v5e
topology: v5e:2x2
jax: 0.10.0
libtpu: 0.0.40
codegen_flags: <defaults>
</compile_context>

<pallas_src>
import math
import functools

import jax
import jax.numpy as jnp
import numpy as np
from jax.experimental import pallas as pl
from jax.experimental.pallas import tpu as pltpu


# ----------------------------- in-kernel helpers -----------------------------

def _layernorm(x, gamma, beta, eps=1e-5):
    # PyTorch LayerNorm: biased variance, eps inside rsqrt.  f32 math.
    mean = jnp.mean(x, axis=-1, keepdims=True)
    var = jnp.mean((x - mean) ** 2, axis=-1, keepdims=True)
    return (x - mean) * jax.lax.rsqrt(var + eps) * gamma + beta


def _gelu_exact(x):
    # PyTorch nn.GELU() default = exact erf formulation.
    return 0.5 * x * (1.0 + jax.lax.erf(x * (1.0 / math.sqrt(2.0))))


# ------------------------------- Pallas kernel --------------------------------

def fused_transformer_kernel(x_ref, wqkv_ref, wo_ref, bqkv_ref,
                             w1_ref, b1_ref, w2_ref, vecs_ref,
                             o_ref, xbuf_ref, *, heads, dim_head):
    """Whole transformer for one batch row; grid = (batch, layer)."""
    l = pl.program_id(1)
    n_layers = pl.num_programs(1)
    bf16 = jnp.bfloat16

    S, D = xbuf_ref.shape
    H, dh = heads, dim_head

    # Load the residual stream into VMEM scratch once per batch row.
    @pl.when(l == 0)
    def _():
        xbuf_ref[...] = x_ref[0]

    vec = vecs_ref[0]            # (8, D) f32: ln1_g, ln1_b, ln2_g, ln2_b, bo, b2, lnf_g, lnf_b
    x0 = xbuf_ref[...]           # (S, D) f32

    # ---------------- Attention (pre-norm) ----------------
    h = _layernorm(x0, vec[0:1], vec[1:2]).astype(bf16)          # (S, D) bf16
    hb = jnp.broadcast_to(h, (3 * H, S, D))                      # (3H, S, D) bf16

    # Wq / bq are pre-scaled by 1/sqrt(dh) in the wrapper; all three
    # projections for all heads in one batched einsum / one weight DMA.
    qkv = jnp.einsum('hsd,hde->hse', hb, wqkv_ref[0],
                     preferred_element_type=jnp.float32) + bqkv_ref[0]  # (3H, S, dh) f32
    q, k, v = qkv[0:H], qkv[H:2 * H], qkv[2 * H:3 * H]           # (H, S, dh) each

    s = jnp.einsum('hqe,hke->hqk', q.astype(bf16), k.astype(bf16),
                   preferred_element_type=jnp.float32)           # (H, S, S) f32
    s = s - jnp.max(s, axis=-1, keepdims=True)
    p = jnp.exp(s)
    p = p * pl.reciprocal(jnp.sum(p, axis=-1, keepdims=True), approx=True)

    o = jnp.einsum('hqk,hke->hqe', p.astype(bf16), v.astype(bf16),
                   preferred_element_type=jnp.float32)           # (H, S, dh) f32
    proj = jnp.einsum('hqe,hed->hqd', o.astype(bf16), wo_ref[0],
                      preferred_element_type=jnp.float32)        # (H, S, D) f32
    attn = jnp.sum(proj, axis=0) + vec[4:5]                      # (S, D) + out-proj bias
    x1 = attn + x0                                               # residual

    # ---------------- FeedForward (pre-norm) ----------------
    h2 = _layernorm(x1, vec[2:3], vec[3:4]).astype(bf16)
    y = jnp.dot(h2, w1_ref[0], preferred_element_type=jnp.float32) + b1_ref[0]
    y = _gelu_exact(y).astype(bf16)
    y = jnp.dot(y, w2_ref[0], preferred_element_type=jnp.float32) + vec[5:6]
    x2 = y + x1                                                  # residual

    xbuf_ref[...] = x2

    # Final LayerNorm fused into the last layer's epilogue.
    @pl.when(l == n_layers - 1)
    def _():
        o_ref[0] = _layernorm(x2, vec[6:7], vec[7:8])


# --------------------------------- wrapper ------------------------------------

def transformer_forward(x, packed, heads, dim_head):
    B, S, D = x.shape
    depth = packed["wqkv"].shape[0]
    mlp_dim = packed["w1"].shape[-1]
    H, dh = heads, dim_head

    kern = functools.partial(fused_transformer_kernel, heads=H, dim_head=dh)

    def xmap(b, l):
        return (b, 0, 0)

    def wmap3(b, l):
        return (l, 0, 0)

    def wmap4(b, l):
        return (l, 0, 0, 0)

    in_specs = [
        pl.BlockSpec((1, S, D), xmap),                    # x
        pl.BlockSpec((1, 3 * H, D, dh), wmap4),           # Wq|Wk|Wv per head (bf16, q pre-scaled)
        pl.BlockSpec((1, H, dh, D), wmap4),               # Wo per head (bf16)
        pl.BlockSpec((1, 3 * H, 1, dh), wmap4),           # q/k/v biases (f32)
        pl.BlockSpec((1, D, mlp_dim), wmap3),             # W1^T (bf16)
        pl.BlockSpec((1, 1, mlp_dim), wmap3),             # b1 (f32)
        pl.BlockSpec((1, mlp_dim, D), wmap3),             # W2^T (bf16)
        pl.BlockSpec((1, 8, D), wmap3),                   # packed LN/bias vectors (f32)
    ]
    out_specs = pl.BlockSpec((1, S, D), xmap)

    return pl.pallas_call(
        kern,
        out_shape=jax.ShapeDtypeStruct((B, S, D), jnp.float32),
        grid=(B, depth),
        in_specs=in_specs,
        out_specs=out_specs,
        scratch_shapes=[pltpu.VMEM((S, D), jnp.float32)],
        compiler_params=pltpu.CompilerParams(
            dimension_semantics=("parallel", "arbitrary"),
            vmem_limit_bytes=32 * 1024 * 1024,
        ),
    )(x, packed["wqkv"], packed["wo"], packed["bqkv"],
      packed["w1"], packed["b1"], packed["w2"], packed["vecs"])


# ------------------ wrapper-side weight packing (layout plumbing) --------------

def pack_params(params, heads, dim_head):
    """PyTorch-layout params -> head-split, pre-scaled, bf16, depth-stacked."""
    D = heads * dim_head
    scale = 1.0 / math.sqrt(dim_head)
    layers = params["layers"]

    def split_w(w, do_scale=False):
        # w: (D_out=H*dh, D_in) rows grouped per head -> (H, D_in, dh)
        wh = w.reshape(heads, dim_head, D).transpose(0, 2, 1)
        if do_scale:
            wh = wh * scale
        return wh

    wqkv, wo, bqkv, w1, b1, w2, vecs = ([] for _ in range(7))
    for L in layers:
        ipw, ipb = L["in_proj_w"], L["in_proj_b"]
        wq = split_w(ipw[:D], do_scale=True)
        wk = split_w(ipw[D:2 * D])
        wv = split_w(ipw[2 * D:])
        wqkv.append(jnp.concatenate([wq, wk, wv], axis=0).astype(jnp.bfloat16))  # (3H, D, dh)
        # out = concat_heads @ out_proj_w.T ; out_proj_w.T : (H*dh, D) -> (H, dh, D)
        wo.append(L["out_proj_w"].T.reshape(heads, dim_head, D).astype(jnp.bfloat16))
        bq = ipb[:D].reshape(heads, dim_head) * scale
        bk = ipb[D:2 * D].reshape(heads, dim_head)
        bv = ipb[2 * D:].reshape(heads, dim_head)
        bqkv.append(jnp.concatenate([bq, bk, bv], axis=0)[:, None, :]
                    .astype(jnp.float32))                                # (3H, 1, dh)
        w1.append(L["w1"].T.astype(jnp.bfloat16))                        # (D, mlp)
        b1.append(L["b1"][None, :].astype(jnp.float32))                  # (1, mlp)
        w2.append(L["w2"].T.astype(jnp.bfloat16))                        # (mlp, D)
        vecs.append(jnp.stack([L["ln1_g"], L["ln1_b"], L["ln2_g"], L["ln2_b"],
                               L["out_proj_b"], L["b2"],
                               params["lnf_g"], params["lnf_b"]], axis=0))  # (8, D)

    st = lambda xs: jnp.stack(xs, axis=0)
    return dict(wqkv=st(wqkv), wo=st(wo), bqkv=st(bqkv),
                w1=st(w1), b1=st(b1), w2=st(w2), vecs=st(vecs))


# ------------------------- deterministic param init ----------------------------

def init_params(key, dim, depth, mlp_dim):
    layers = []
    for li in range(depth):
        k = jax.random.fold_in(key, li)
        ks = jax.random.split(k, 10)
        layers.append(dict(
            ln1_g=1.0 + 0.1 * jax.random.normal(ks[6], (dim,), jnp.float32),
            ln1_b=0.05 * jax.random.normal(ks[7], (dim,), jnp.float32),
            in_proj_w=0.02 * jax.random.normal(ks[0], (3 * dim, dim), jnp.float32),
            in_proj_b=0.02 * jax.random.normal(ks[1], (3 * dim,), jnp.float32),
            out_proj_w=0.02 * jax.random.normal(ks[2], (dim, dim), jnp.float32),
            out_proj_b=0.02 * jax.random.normal(ks[3], (dim,), jnp.float32),
            ln2_g=1.0 + 0.1 * jax.random.normal(ks[8], (dim,), jnp.float32),
            ln2_b=0.05 * jax.random.normal(ks[9], (dim,), jnp.float32),
            w1=0.02 * jax.random.normal(ks[4], (mlp_dim, dim), jnp.float32),
            b1=0.01 * jnp.ones((mlp_dim,), jnp.float32),
            w2=0.02 * jax.random.normal(ks[5], (dim, mlp_dim), jnp.float32),
            b2=0.01 * jnp.ones((dim,), jnp.float32),
        ))
    return dict(
        layers=layers,
        lnf_g=jnp.ones((dim,), jnp.float32),
        lnf_b=jnp.zeros((dim,), jnp.float32),
    )


# ---------------------------- pure-JAX f32 reference ----------------------------

def reference_forward(x, params, heads, dim_head):
    D = heads * dim_head

    def ln(v, g, b):
        m = jnp.mean(v, axis=-1, keepdims=True)
        s = jnp.mean((v - m) ** 2, axis=-1, keepdims=True)
        return (v - m) / jnp.sqrt(s + 1e-5) * g + b

    B, S, _ = x.shape
    for L in params["layers"]:
        h = ln(x, L["ln1_g"], L["ln1_b"])
        qkv = h @ L["in_proj_w"].T + L["in_proj_b"]
        q, k, v = qkv[..., :D], qkv[..., D:2 * D], qkv[..., 2 * D:]
        qh = q.reshape(B, S, heads, dim_head).transpose(0, 2, 1, 3)
        kh = k.reshape(B, S, heads, dim_head).transpose(0, 2, 1, 3)
        vh = v.reshape(B, S, heads, dim_head).transpose(0, 2, 1, 3)
        s = jnp.einsum("bhqd,bhkd->bhqk", qh, kh) / math.sqrt(dim_head)
        p = jax.nn.softmax(s, axis=-1)
        o = jnp.einsum("bhqk,bhkd->bhqd", p, vh).transpose(0, 2, 1, 3).reshape(B, S, D)
        o = o @ L["out_proj_w"].T + L["out_proj_b"]
        x = o + x
        h2 = ln(x, L["ln2_g"], L["ln2_b"])
        y = h2 @ L["w1"].T + L["b1"]
        y = 0.5 * y * (1.0 + jax.lax.erf(y / math.sqrt(2.0)))
        y = y @ L["w2"].T + L["b2"]
        x = y + x
    return ln(x, params["lnf_g"], params["lnf_b"])


# ------------------------------------ main --------------------------------------

if __name__ == "__main__":
    B, S = 2, 8
    dim, depth, heads, mlp_dim = 32, 2, 4, 64
    dim_head = dim // heads

    key = jax.random.PRNGKey(0)
    kx, kp = jax.random.split(key)
    x = jax.random.normal(kx, (B, S, dim), jnp.float32)
    params = init_params(kp, dim, depth, mlp_dim)
    packed = pack_params(params, heads, dim_head)

    out = transformer_forward(x, packed, heads, dim_head)
    out = jax.block_until_ready(out)

    ref = reference_forward(x, params, heads, dim_head)
    # Tolerance loosened vs a pure-f32 reference: matmuls run with bf16 inputs
    # (f32 accumulation) and softmax uses the EUP approx reciprocal.
    np.testing.assert_allclose(np.asarray(out), np.asarray(ref), atol=2e-2, rtol=2e-2)

    print("KERNEL_OK")
</pallas_src>

<mosaic_0001>
module attributes {stable_mosaic.version = 11 : i64} {
  func.func @fused_transformer_kernel(%arg0: i32, %arg1: i32, %arg2: memref<1x8x32xf32, #tpu.memory_space<vmem>>, %arg3: memref<1x12x32x8xbf16, #tpu.memory_space<vmem>>, %arg4: memref<1x4x8x32xbf16, #tpu.memory_space<vmem>>, %arg5: memref<1x12x1x8xf32, #tpu.memory_space<vmem>>, %arg6: memref<1x32x64xbf16, #tpu.memory_space<vmem>>, %arg7: memref<1x1x64xf32, #tpu.memory_space<vmem>>, %arg8: memref<1x64x32xbf16, #tpu.memory_space<vmem>>, %arg9: memref<1x8x32xf32, #tpu.memory_space<vmem>>, %arg10: memref<1x8x32xf32, #tpu.memory_space<vmem>>, %arg11: memref<8x32xf32, #tpu.memory_space<vmem>>) attributes {dimension_semantics = [#tpu.dimension_semantics<parallel>, #tpu.dimension_semantics<arbitrary>], iteration_bounds = array<i64: 2, 2>, scalar_prefetch = 0 : i64, scratch_operands = 1 : i64, tpu.core_type = #tpu.core_type<tc>, window_params = [{transform_indices = @transform_0, window_bounds = array<i64: 1, 8, 32>}, {transform_indices = @transform_1, window_bounds = array<i64: 1, 12, 32, 8>}, {transform_indices = @transform_2, window_bounds = array<i64: 1, 4, 8, 32>}, {transform_indices = @transform_3, window_bounds = array<i64: 1, 12, 1, 8>}, {transform_indices = @transform_4, window_bounds = array<i64: 1, 32, 64>}, {transform_indices = @transform_5, window_bounds = array<i64: 1, 1, 64>}, {transform_indices = @transform_6, window_bounds = array<i64: 1, 64, 32>}, {transform_indices = @transform_7, window_bounds = array<i64: 1, 8, 32>}, {transform_indices = @transform_8, window_bounds = array<i64: 1, 8, 32>}]} {
    %c0_i32 = arith.constant 0 : i32
    %0 = arith.cmpi eq, %arg1, %c0_i32 : i32
    %1 = arith.extui %0 : i1 to i32
    %c0_i32_0 = arith.constant 0 : i32
    %2 = arith.cmpi ne, %1, %c0_i32_0 : i32
    scf.if %2 {
      %c0_50 = arith.constant 0 : index
      %c0_51 = arith.constant 0 : index
      %c0_52 = arith.constant 0 : index
      %120 = vector.load %arg2[%c0_50, %c0_51, %c0_52] : memref<1x8x32xf32, #tpu.memory_space<vmem>>, vector<1x8x32xf32>
      %121 = vector.shape_cast %120 : vector<1x8x32xf32> to vector<8x32xf32>
      %c0_53 = arith.constant 0 : index
      %c0_54 = arith.constant 0 : index
      %122 = vector.load %arg11[%c0_53, %c0_54] : memref<8x32xf32, #tpu.memory_space<vmem>>, vector<8x32xf32>
      tpu.vector_store %arg11[%c0_53, %c0_54], %121 {strides = array<i32>} : memref<8x32xf32, #tpu.memory_space<vmem>>, vector<8x32xf32>,
    } else {
    }
    %c0 = arith.constant 0 : index
    %c0_1 = arith.constant 0 : index
    %c0_2 = arith.constant 0 : index
    %3 = vector.load %arg9[%c0, %c0_1, %c0_2] : memref<1x8x32xf32, #tpu.memory_space<vmem>>, vector<1x8x32xf32>
    %4 = vector.shape_cast %3 : vector<1x8x32xf32> to vector<8x32xf32>
    %c0_3 = arith.constant 0 : index
    %c0_4 = arith.constant 0 : index
    %5 = vector.load %arg11[%c0_3, %c0_4] : memref<8x32xf32, #tpu.memory_space<vmem>>, vector<8x32xf32>
    %6 = vector.extract_strided_slice %4 {offsets = [0, 0], sizes = [1, 32], strides = [1, 1]} : vector<8x32xf32> to vector<1x32xf32>
    %7 = vector.extract_strided_slice %4 {offsets = [1, 0], sizes = [1, 32], strides = [1, 1]} : vector<8x32xf32> to vector<1x32xf32>
    %cst = arith.constant dense<0.000000e+00> : vector<8xf32>
    %8 = vector.multi_reduction <add>, %5, %cst [1] : vector<8x32xf32> to vector<8xf32>
    %9 = vector.shape_cast %8 : vector<8xf32> to vector<8x1xf32>
    %cst_5 = arith.constant 3.200000e+01 : f32
    %10 = vector.broadcast %cst_5 : f32 to vector<8x1xf32>
    %11 = arith.divf %9, %10 : vector<8x1xf32>
    %12 = vector.broadcast %11 : vector<8x1xf32> to vector<8x32xf32>
    %13 = arith.subf %5, %12 : vector<8x32xf32>
    %14 = arith.mulf %13, %13 : vector<8x32xf32>
    %cst_6 = arith.constant dense<0.000000e+00> : vector<8xf32>
    %15 = vector.multi_reduction <add>, %14, %cst_6 [1] : vector<8x32xf32> to vector<8xf32>
    %16 = vector.shape_cast %15 : vector<8xf32> to vector<8x1xf32>
    %cst_7 = arith.constant 3.200000e+01 : f32
    %17 = vector.broadcast %cst_7 : f32 to vector<8x1xf32>
    %18 = arith.divf %16, %17 : vector<8x1xf32>
    %19 = vector.broadcast %11 : vector<8x1xf32> to vector<8x32xf32>
    %20 = arith.subf %5, %19 : vector<8x32xf32>
    %cst_8 = arith.constant 9.99999974E-6 : f32
    %21 = vector.broadcast %cst_8 : f32 to vector<8x1xf32>
    %22 = arith.addf %18, %21 : vector<8x1xf32>
    %23 = math.rsqrt %22 : vector<8x1xf32>
    %24 = vector.broadcast %23 : vector<8x1xf32> to vector<8x32xf32>
    %25 = arith.mulf %20, %24 : vector<8x32xf32>
    %26 = vector.broadcast %6 : vector<1x32xf32> to vector<8x32xf32>
    %27 = arith.mulf %25, %26 : vector<8x32xf32>
    %28 = vector.broadcast %7 : vector<1x32xf32> to vector<8x32xf32>
    %29 = arith.addf %27, %28 : vector<8x32xf32>
    %30 = arith.truncf %29 : vector<8x32xf32> to vector<8x32xbf16>
    %31 = vector.shape_cast %30 : vector<8x32xbf16> to vector<1x8x32xbf16>
    %32 = vector.broadcast %31 : vector<1x8x32xbf16> to vector<12x8x32xbf16>
    %c0_9 = arith.constant 0 : index
    %c0_10 = arith.constant 0 : index
    %c0_11 = arith.constant 0 : index
    %c0_12 = arith.constant 0 : index
    %33 = vector.load %arg3[%c0_9, %c0_10, %c0_11, %c0_12] : memref<1x12x32x8xbf16, #tpu.memory_space<vmem>>, vector<1x12x32x8xbf16>
    %34 = vector.shape_cast %33 : vector<1x12x32x8xbf16> to vector<12x32x8xbf16>
    "tpu.trace_start"() <{level = 10 : i32, message = "hsd,hde->hse"}> : () -> ()
    %cst_13 = arith.constant dense<0.000000e+00> : vector<12x8x8xf32>
    %35 = tpu.matmul %32, %34, %cst_13 {dimension_numbers = #tpu.dot_dimension_numbers<[2], [1], [1], [2], [0, 0, 0, 1, 1, 2], [0], [0]>} : vector<12x8x32xbf16>, vector<12x32x8xbf16>, vector<12x8x8xf32> -> vector<12x8x8xf32>
    "tpu.trace_stop"() : () -> ()
    %c0_14 = arith.constant 0 : index
    %c0_15 = arith.constant 0 : index
    %c0_16 = arith.constant 0 : index
    %c0_17 = arith.constant 0 : index
    %36 = vector.load %arg5[%c0_14, %c0_15, %c0_16, %c0_17] : memref<1x12x1x8xf32, #tpu.memory_space<vmem>>, vector<1x12x1x8xf32>
    %37 = vector.shape_cast %36 : vector<1x12x1x8xf32> to vector<12x1x8xf32>
    %38 = vector.broadcast %37 : vector<12x1x8xf32> to vector<12x8x8xf32>
    %39 = arith.addf %35, %38 : vector<12x8x8xf32>
    %40 = vector.extract_strided_slice %39 {offsets = [0, 0, 0], sizes = [4, 8, 8], strides = [1, 1, 1]} : vector<12x8x8xf32> to vector<4x8x8xf32>
    %41 = vector.extract_strided_slice %39 {offsets = [4, 0, 0], sizes = [4, 8, 8], strides = [1, 1, 1]} : vector<12x8x8xf32> to vector<4x8x8xf32>
    %42 = vector.extract_strided_slice %39 {offsets = [8, 0, 0], sizes = [4, 8, 8], strides = [1, 1, 1]} : vector<12x8x8xf32> to vector<4x8x8xf32>
    %43 = arith.truncf %40 : vector<4x8x8xf32> to vector<4x8x8xbf16>
    %44 = arith.truncf %41 : vector<4x8x8xf32> to vector<4x8x8xbf16>
    "tpu.trace_start"() <{level = 10 : i32, message = "hqe,hke->hqk"}> : () -> ()
    %cst_18 = arith.constant dense<0.000000e+00> : vector<4x8x8xf32>
    %45 = tpu.matmul %43, %44, %cst_18 {dimension_numbers = #tpu.dot_dimension_numbers<[2], [2], [1], [1], [0, 0, 0, 1, 1, 1], [0], [0]>} : vector<4x8x8xbf16>, vector<4x8x8xbf16>, vector<4x8x8xf32> -> vector<4x8x8xf32>
    "tpu.trace_stop"() : () -> ()
    %cst_19 = arith.constant dense<0xFF800000> : vector<4x8xf32>
    %46 = vector.multi_reduction <maximumf>, %45, %cst_19 [2] : vector<4x8x8xf32> to vector<4x8xf32>
    %47 = vector.shape_cast %46 : vector<4x8xf32> to vector<4x8x1xf32>
    %48 = vector.broadcast %47 : vector<4x8x1xf32> to vector<4x8x8xf32>
    %49 = arith.subf %45, %48 : vector<4x8x8xf32>
    %50 = math.exp %49 : vector<4x8x8xf32>
    %cst_20 = arith.constant dense<0.000000e+00> : vector<4x8xf32>
    %51 = vector.multi_reduction <add>, %50, %cst_20 [2] : vector<4x8x8xf32> to vector<4x8xf32>
    %52 = vector.shape_cast %51 : vector<4x8xf32> to vector<4x8x1xf32>
    %53 = tpu.reciprocal %52 {approx = true} : vector<4x8x1xf32> -> vector<4x8x1xf32>
    %54 = vector.broadcast %53 : vector<4x8x1xf32> to vector<4x8x8xf32>
    %55 = arith.mulf %50, %54 : vector<4x8x8xf32>
    %56 = arith.truncf %55 : vector<4x8x8xf32> to vector<4x8x8xbf16>
    %57 = arith.truncf %42 : vector<4x8x8xf32> to vector<4x8x8xbf16>
    "tpu.trace_start"() <{level = 10 : i32, message = "hqk,hke->hqe"}> : () -> ()
    %cst_21 = arith.constant dense<0.000000e+00> : vector<4x8x8xf32>
    %58 = tpu.matmul %56, %57, %cst_21 {dimension_numbers = #tpu.dot_dimension_numbers<[2], [1], [1], [2], [0, 0, 0, 1, 1, 2], [0], [0]>} : vector<4x8x8xbf16>, vector<4x8x8xbf16>, vector<4x8x8xf32> -> vector<4x8x8xf32>
    "tpu.trace_stop"() : () -> ()
    %59 = arith.truncf %58 : vector<4x8x8xf32> to vector<4x8x8xbf16>
    %c0_22 = arith.constant 0 : index
    %c0_23 = arith.constant 0 : index
    %c0_24 = arith.constant 0 : index
    %c0_25 = arith.constant 0 : index
    %60 = vector.load %arg4[%c0_22, %c0_23, %c0_24, %c0_25] : memref<1x4x8x32xbf16, #tpu.memory_space<vmem>>, vector<1x4x8x32xbf16>
    %61 = vector.shape_cast %60 : vector<1x4x8x32xbf16> to vector<4x8x32xbf16>
    "tpu.trace_start"() <{level = 10 : i32, message = "hqe,hed->hqd"}> : () -> ()
    %cst_26 = arith.constant dense<0.000000e+00> : vector<4x8x32xf32>
    %62 = tpu.matmul %59, %61, %cst_26 {dimension_numbers = #tpu.dot_dimension_numbers<[2], [1], [1], [2], [0, 0, 0, 1, 1, 2], [0], [0]>} : vector<4x8x8xbf16>, vector<4x8x32xbf16>, vector<4x8x32xf32> -> vector<4x8x32xf32>
    "tpu.trace_stop"() : () -> ()
    %cst_27 = arith.constant dense<0.000000e+00> : vector<8x32xf32>
    %63 = vector.multi_reduction <add>, %62, %cst_27 [0] : vector<4x8x32xf32> to vector<8x32xf32>
    %64 = vector.extract_strided_slice %4 {offsets = [4, 0], sizes = [1, 32], strides = [1, 1]} : vector<8x32xf32> to vector<1x32xf32>
    %65 = vector.broadcast %64 : vector<1x32xf32> to vector<8x32xf32>
    %66 = arith.addf %63, %65 : vector<8x32xf32>
    %67 = arith.addf %66, %5 : vector<8x32xf32>
    %68 = vector.extract_strided_slice %4 {offsets = [2, 0], sizes = [1, 32], strides = [1, 1]} : vector<8x32xf32> to vector<1x32xf32>
    %69 = vector.extract_strided_slice %4 {offsets = [3, 0], sizes = [1, 32], strides = [1, 1]} : vector<8x32xf32> to vector<1x32xf32>
    %cst_28 = arith.constant dense<0.000000e+00> : vector<8xf32>
    %70 = vector.multi_reduction <add>, %67, %cst_28 [1] : vector<8x32xf32> to vector<8xf32>
    %71 = vector.shape_cast %70 : vector<8xf32> to vector<8x1xf32>
    %cst_29 = arith.constant 3.200000e+01 : f32
    %72 = vector.broadcast %cst_29 : f32 to vector<8x1xf32>
    %73 = arith.divf %71, %72 : vector<8x1xf32>
    %74 = vector.broadcast %73 : vector<8x1xf32> to vector<8x32xf32>
    %75 = arith.subf %67, %74 : vector<8x32xf32>
    %76 = arith.mulf %75, %75 : vector<8x32xf32>
    %cst_30 = arith.constant dense<0.000000e+00> : vector<8xf32>
    %77 = vector.multi_reduction <add>, %76, %cst_30 [1] : vector<8x32xf32> to vector<8xf32>
    %78 = vector.shape_cast %77 : vector<8xf32> to vector<8x1xf32>
    %cst_31 = arith.constant 3.200000e+01 : f32
    %79 = vector.broadcast %cst_31 : f32 to vector<8x1xf32>
    %80 = arith.divf %78, %79 : vector<8x1xf32>
    %81 = vector.broadcast %73 : vector<8x1xf32> to vector<8x32xf32>
    %82 = arith.subf %67, %81 : vector<8x32xf32>
    %cst_32 = arith.constant 9.99999974E-6 : f32
    %83 = vector.broadcast %cst_32 : f32 to vector<8x1xf32>
    %84 = arith.addf %80, %83 : vector<8x1xf32>
    %85 = math.rsqrt %84 : vector<8x1xf32>
    %86 = vector.broadcast %85 : vector<8x1xf32> to vector<8x32xf32>
    %87 = arith.mulf %82, %86 : vector<8x32xf32>
    %88 = vector.broadcast %68 : vector<1x32xf32> to vector<8x32xf32>
    %89 = arith.mulf %87, %88 : vector<8x32xf32>
    %90 = vector.broadcast %69 : vector<1x32xf32> to vector<8x32xf32>
    %91 = arith.addf %89, %90 : vector<8x32xf32>
    %92 = arith.truncf %91 : vector<8x32xf32> to vector<8x32xbf16>
    %c0_33 = arith.constant 0 : index
    %c0_34 = arith.constant 0 : index
    %c0_35 = arith.constant 0 : index
    %93 = vector.load %arg6[%c0_33, %c0_34, %c0_35] : memref<1x32x64xbf16, #tpu.memory_space<vmem>>, vector<1x32x64xbf16>
    %94 = vector.shape_cast %93 : vector<1x32x64xbf16> to vector<32x64xbf16>
    %cst_36 = arith.constant dense<0.000000e+00> : vector<8x64xf32>
    %95 = tpu.matmul %92, %94, %cst_36 {dimension_numbers = #tpu.dot_dimension_numbers<[1], [0], [0], [1], [0, 0, 1, 1], [], []>} : vector<8x32xbf16>, vector<32x64xbf16>, vector<8x64xf32> -> vector<8x64xf32>
    %c0_37 = arith.constant 0 : index
    %c0_38 = arith.constant 0 : index
    %c0_39 = arith.constant 0 : index
    %96 = vector.load %arg7[%c0_37, %c0_38, %c0_39] : memref<1x1x64xf32, #tpu.memory_space<vmem>>, vector<1x1x64xf32>
    %97 = vector.shape_cast %96 : vector<1x1x64xf32> to vector<1x64xf32>
    %98 = vector.broadcast %97 : vector<1x64xf32> to vector<8x64xf32>
    %99 = arith.addf %95, %98 : vector<8x64xf32>
    %cst_40 = arith.constant 5.000000e-01 : f32
    %100 = vector.broadcast %cst_40 : f32 to vector<8x64xf32>
    %101 = arith.mulf %100, %99 : vector<8x64xf32>
    %cst_41 = arith.constant 0.707106769 : f32
    %102 = vector.broadcast %cst_41 : f32 to vector<8x64xf32>
    %103 = arith.mulf %99, %102 : vector<8x64xf32>
    %104 = math.erf %103 : vector<8x64xf32>
    %cst_42 = arith.constant 1.000000e+00 : f32
    %105 = vector.broadcast %cst_42 : f32 to vector<8x64xf32>
    %106 = arith.addf %105, %104 : vector<8x64xf32>
    %107 = arith.mulf %101, %106 : vector<8x64xf32>
    %108 = arith.truncf %107 : vector<8x64xf32> to vector<8x64xbf16>
    %c0_43 = arith.constant 0 : index
    %c0_44 = arith.constant 0 : index
    %c0_45 = arith.constant 0 : index
    %109 = vector.load %arg8[%c0_43, %c0_44, %c0_45] : memref<1x64x32xbf16, #tpu.memory_space<vmem>>, vector<1x64x32xbf16>
    %110 = vector.shape_cast %109 : vector<1x64x32xbf16> to vector<64x32xbf16>
    %cst_46 = arith.constant dense<0.000000e+00> : vector<8x32xf32>
    %111 = tpu.matmul %108, %110, %cst_46 {dimension_numbers = #tpu.dot_dimension_numbers<[1], [0], [0], [1], [0, 0, 1, 1], [], []>} : vector<8x64xbf16>, vector<64x32xbf16>, vector<8x32xf32> -> vector<8x32xf32>
    %112 = vector.extract_strided_slice %4 {offsets = [5, 0], sizes = [1, 32], strides = [1, 1]} : vector<8x32xf32> to vector<1x32xf32>
    %113 = vector.broadcast %112 : vector<1x32xf32> to vector<8x32xf32>
    %114 = arith.addf %111, %113 : vector<8x32xf32>
    %115 = arith.addf %114, %67 : vector<8x32xf32>
    %c0_47 = arith.constant 0 : index
    %c0_48 = arith.constant 0 : index
    %116 = vector.load %arg11[%c0_47, %c0_48] : memref<8x32xf32, #tpu.memory_space<vmem>>, vector<8x32xf32>
    tpu.vector_store %arg11[%c0_47, %c0_48], %115 {strides = array<i32>} : memref<8x32xf32, #tpu.memory_space<vmem>>, vector<8x32xf32>,
    %c1_i32 = arith.constant 1 : i32
    %117 = arith.cmpi eq, %arg1, %c1_i32 : i32
    %118 = arith.extui %117 : i1 to i32
    %c0_i32_49 = arith.constant 0 : i32
    %119 = arith.cmpi ne, %118, %c0_i32_49 : i32
    scf.if %119 {
      %120 = vector.extract_strided_slice %4 {offsets = [6, 0], sizes = [1, 32], strides = [1, 1]} : vector<8x32xf32> to vector<1x32xf32>
      %121 = vector.extract_strided_slice %4 {offsets = [7, 0], sizes = [1, 32], strides = [1, 1]} : vector<8x32xf32> to vector<1x32xf32>
      %cst_50 = arith.constant dense<0.000000e+00> : vector<8xf32>
      %122 = vector.multi_reduction <add>, %115, %cst_50 [1] : vector<8x32xf32> to vector<8xf32>
      %123 = vector.shape_cast %122 : vector<8xf32> to vector<8x1xf32>
      %cst_51 = arith.constant 3.200000e+01 : f32
      %124 = vector.broadcast %cst_51 : f32 to vector<8x1xf32>
      %125 = arith.divf %123, %124 : vector<8x1xf32>
      %126 = vector.broadcast %125 : vector<8x1xf32> to vector<8x32xf32>
      %127 = arith.subf %115, %126 : vector<8x32xf32>
      %128 = arith.mulf %127, %127 : vector<8x32xf32>
      %cst_52 = arith.constant dense<0.000000e+00> : vector<8xf32>
      %129 = vector.multi_reduction <add>, %128, %cst_52 [1] : vector<8x32xf32> to vector<8xf32>
      %130 = vector.shape_cast %129 : vector<8xf32> to vector<8x1xf32>
      %cst_53 = arith.constant 3.200000e+01 : f32
      %131 = vector.broadcast %cst_53 : f32 to vector<8x1xf32>
      %132 = arith.divf %130, %131 : vector<8x1xf32>
      %133 = vector.broadcast %125 : vector<8x1xf32> to vector<8x32xf32>
      %134 = arith.subf %115, %133 : vector<8x32xf32>
      %cst_54 = arith.constant 9.99999974E-6 : f32
      %135 = vector.broadcast %cst_54 : f32 to vector<8x1xf32>
      %136 = arith.addf %132, %135 : vector<8x1xf32>
      %137 = math.rsqrt %136 : vector<8x1xf32>
      %138 = vector.broadcast %137 : vector<8x1xf32> to vector<8x32xf32>
      %139 = arith.mulf %134, %138 : vector<8x32xf32>
      %140 = vector.broadcast %120 : vector<1x32xf32> to vector<8x32xf32>
      %141 = arith.mulf %139, %140 : vector<8x32xf32>
      %142 = vector.broadcast %121 : vector<1x32xf32> to vector<8x32xf32>
      %143 = arith.addf %141, %142 : vector<8x32xf32>
      %c0_55 = arith.constant 0 : index
      %c0_56 = arith.constant 0 : index
      %c0_57 = arith.constant 0 : index
      %144 = vector.load %arg10[%c0_55, %c0_56, %c0_57] : memref<1x8x32xf32, #tpu.memory_space<vmem>>, vector<1x8x32xf32>
      %145 = vector.shape_cast %144 : vector<1x8x32xf32> to vector<8x32xf32>
      %146 = vector.shape_cast %143 : vector<8x32xf32> to vector<1x8x32xf32>
      tpu.vector_store %arg10[%c0_55, %c0_56, %c0_57], %146 {strides = array<i32>} : memref<1x8x32xf32, #tpu.memory_space<vmem>>, vector<1x8x32xf32>,
    } else {
    }
    return
  }
  func.func @transform_0(%arg0: i32, %arg1: i32) -> (i32, i32, i32) {
    %c0_i32 = arith.constant 0 : i32
    %c0_i32_0 = arith.constant 0 : i32
    %c0_i32_1 = arith.constant 0 : i32
    return %arg0, %c0_i32, %c0_i32_0 : i32, i32, i32
  }
  func.func @transform_1(%arg0: i32, %arg1: i32) -> (i32, i32, i32, i32) {
    %c0_i32 = arith.constant 0 : i32
    %c0_i32_0 = arith.constant 0 : i32
    %c0_i32_1 = arith.constant 0 : i32
    %c0_i32_2 = arith.constant 0 : i32
    return %arg1, %c0_i32, %c0_i32_0, %c0_i32_1 : i32, i32, i32, i32
  }
  func.func @transform_2(%arg0: i32, %arg1: i32) -> (i32, i32, i32, i32) {
    %c0_i32 = arith.constant 0 : i32
    %c0_i32_0 = arith.constant 0 : i32
    %c0_i32_1 = arith.constant 0 : i32
    %c0_i32_2 = arith.constant 0 : i32
    return %arg1, %c0_i32, %c0_i32_0, %c0_i32_1 : i32, i32, i32, i32
  }
  func.func @transform_3(%arg0: i32, %arg1: i32) -> (i32, i32, i32, i32) {
    %c0_i32 = arith.constant 0 : i32
    %c0_i32_0 = arith.constant 0 : i32
    %c0_i32_1 = arith.constant 0 : i32
    %c0_i32_2 = arith.constant 0 : i32
    return %arg1, %c0_i32, %c0_i32_0, %c0_i32_1 : i32, i32, i32, i32
  }
  func.func @transform_4(%arg0: i32, %arg1: i32) -> (i32, i32, i32) {
    %c0_i32 = arith.constant 0 : i32
    %c0_i32_0 = arith.constant 0 : i32
    %c0_i32_1 = arith.constant 0 : i32
    return %arg1, %c0_i32, %c0_i32_0 : i32, i32, i32
  }
  func.func @transform_5(%arg0: i32, %arg1: i32) -> (i32, i32, i32) {
    %c0_i32 = arith.constant 0 : i32
    %c0_i32_0 = arith.constant 0 : i32
    %c0_i32_1 = arith.constant 0 : i32
    return %arg1, %c0_i32, %c0_i32_0 : i32, i32, i32
  }
  func.func @transform_6(%arg0: i32, %arg1: i32) -> (i32, i32, i32) {
    %c0_i32 = arith.constant 0 : i32
    %c0_i32_0 = arith.constant 0 : i32
    %c0_i32_1 = arith.constant 0 : i32
    return %arg1, %c0_i32, %c0_i32_0 : i32, i32, i32
  }
  func.func @transform_7(%arg0: i32, %arg1: i32) -> (i32, i32, i32) {
    %c0_i32 = arith.constant 0 : i32
    %c0_i32_0 = arith.constant 0 : i32
    %c0_i32_1 = arith.constant 0 : i32
    return %arg1, %c0_i32, %c0_i32_0 : i32, i32, i32
  }
  func.func @transform_8(%arg0: i32, %arg1: i32) -> (i32, i32, i32) {
    %c0_i32 = arith.constant 0 : i32
    %c0_i32_0 = arith.constant 0 : i32
    %c0_i32_1 = arith.constant 0 : i32
    return %arg0, %c0_i32, %c0_i32_0 : i32, i32, i32
  }
}

</mosaic_0001>

<bundles_post_ra>
// kernel: tpu_custom_call.1
= control target key start
LH: loop header
LB: loop body
LE: loop exit
PB: predicated region body
PF: predicated region fallthrough
CT: control target
= control target key end

     0   :  { %s2317_s0 = inlined_call_operand.vmem [shape: f32[2,8,32], index: 0, kind: input, shape index: {}]   ;;  %s2318_s1 = inlined_call_operand.vmem [shape: bf16[2,12,32,8], index: 1, kind: input, shape index: {}]   ;;  %s2319_s2 = inlined_call_operand.vmem [shape: bf16[2,4,8,32], index: 2, kind: input, shape index: {}]   ;;  %s2320_s3 = inlined_call_operand.vmem [shape: f32[2,12,1,8], index: 3, kind: input, shape index: {}]   ;;  %s2321_s4 = inlined_call_operand.vmem [shape: bf16[2,32,64], index: 4, kind: input, shape index: {}]   ;;  %s2322_s5 = inlined_call_operand.vmem [shape: f32[2,1,64], index: 5, kind: input, shape index: {}]   ;;  %s2323_s6 = inlined_call_operand.vmem [shape: bf16[2,64,32], index: 6, kind: input, shape index: {}]   ;;  %s2324_s7 = inlined_call_operand.vmem [shape: f32[2,8,32], index: 7, kind: input, shape index: {}]   ;;  %s2325_s8 = inlined_call_operand.hbm [shape: f32[2,8,32], index: 8, kind: output, shape index: {}]  }
   0x1   :  { %2336 = sst [smem:[#allocation15_spill]] %s2317_s0 }
   0x2   :  { %2337 = sst [smem:[#allocation16_spill]] %s2318_s1 }
   0x3   :  { %2338 = sst [smem:[#allocation17_spill]] %s2319_s2 }
   0x4   :  { %2339 = sst [smem:[#allocation18_spill]] %s2325_s8 }
   0x5   :  { %13 = vsyncpa [#allocation4], 0 }
   0x6   :  { %15 = vsyncpa [#allocation4 + $0x1], 0  ;;  %s2007_s27 = smov 0   ;;  %s2009_s28 = smov 0  }
   0x7   :  { %s2011_s29 = smov 0   ;;  %s2013_s30 = smov 0  }
   0x8   :  { %s2015_s9 = smov 0   ;;  %s2017_s10 = smov 0  }
   0x9   :  { %s2019_s11 = smov 0   ;;  %s2021_s12 = smov 0  }
   0xa LB: > { %2340 = sst [smem:[#allocation6_spill]] %s1931_s27  ;;  %s1551_s13 = sadd.s32 4294967295, %s1959_s12   ;;  %s1959_s12 = sphi %s2021_s12, %s21_s12   ;;  %s1955_s11 = sphi %s2019_s11, %s2365_s11   ;;  %s1951_s10 = sphi %s2017_s10, %s2364_s10   ;;  %s1947_s9 = sphi %s2015_s9, %s2363_s9   ;;  %s1943_s30 = sphi %s2013_s30, %s2362_s30   ;;  %s1939_s29 = sphi %s2011_s29, %s2361_s29   ;;  %s1935_s28 = sphi %s2009_s28, %s2367_s28   ;;  %s1931_s27 = sphi %s2007_s27, %s2366_s27  }
   0xb   : > { %2341 = sst [smem:[#allocation7_spill]] %s1939_s29  ;;  %s1552_s14 = sadd.s32 4294967294, %s1959_s12  }
   0xc   : > { %2342 = sst [smem:[#allocation8_spill]] %s1951_s10  ;;  %s30_s15 = sadd.s32 1, %s1951_s10 }
   0xd   : > { %2343 = sst [smem:[#allocation9_spill]] %s1955_s11  ;;  %p31_p0 = scmp.ge.s32.totalorder %s30_s15, 2 }
   0xe   : > { %2344 = sst [smem:[#allocation10_spill]] %s1959_s12  ;;  %s33_s16 = sadd.s32 1, %s1955_s11 }
   0xf   : > { %p258_p1 = scmp.ne.s32.totalorder %s1939_s29, %s1935_s28  ;;  %p259_p2 = scmp.eq.s32.totalorder %s1551_s13, 3 }
  0x10   : > { %s2369_s15 = smov (%p31_p0, %s30_s15), 0  ;;  %s2371_s16 = smov (!%p31_p0, %s33_s16), %s1955_s11 }
  0x11   : > { %2345 = sst [smem:[#allocation11_spill]] %s2369_s15  ;;  %p2056_p3 = por %p259_p2, %p258_p1 }
  0x12   : > { %p264_p4 = scmp.ne.s32.totalorder %s1935_s28, %s1931_s27  ;;  %p35_p5 = scmp.ge.s32.totalorder %s2371_s16, 2 }
  0x13   : > { %p265_p6 = scmp.eq.s32.totalorder %s1552_s14, 3  ;;  %p1555_p7 = scmp.ge.s32.totalorder %s1959_s12, 1 }
  0x14   : > { %p342_p8 = scmp.lt.s32.totalorder %s1959_s12, 5  ;;  %s2373_s16 = smov (%p35_p5, %s2371_s16), 0 }
  0x15   : > { %2347 = sst [smem:[#allocation12_spill]] %s2373_s16  ;;  %p2066_p9 = por %p265_p6, %p264_p4 }
  0x16   : > { %p343_p10 = pnand %p1555_p7, %p342_p8  ;;  %s245_s19 = ssub.s32 %s1955_s11, %s2373_s16 }
  0x17   : > { %s2348_s18 = scalar_select %p2066_p9, 1, 0 }
  0x18   : > { %s248_s20 = sadd.s32 1, %s1939_s29  ;;  %p246_p11 = scmp.eq.s32.totalorder %s245_s19, 0 }
  0x19   : > { %2349 = sst [smem:[#allocation13_spill]] %s2348_s18  ;;  %346 = sbr.rel (%p343_p10) target bundleno = 2030 (0x7ee), region = 52 }
  0x1a   : > { %s2074_s21 = scalar_select %p246_p11, %s1939_s29, %s248_s20  }
  0x1b   : > { %s2327_s22 = sand.u32 (!%p343_p10), 1, %s1935_s28   ;;  %p406_p12 = scmp.lt.s32.totalorder (!%p343_p10), %s1947_s9, 1 }
  0x1c   : > { %2350 = sst [smem:[#allocation14_spill]] %s2074_s21  ;;  %s2080_s23 = sshll.u32 (!%p343_p10), %s2327_s22, 3 }
  0x1d   : > { %p410_p13 = scmp.lt.s32.totalorder (!%p343_p10), %s1943_s30, 1  ;;  %s2351_s0 = sld [smem:[#allocation15_spill]] (!%p343_p10) }
  0x1e   : > { %s407_s24 = scalar_select %p406_p12, %s1947_s9, 1 }
  0x1f   : > { %s2085_s25 = scalar_select %p410_p13, %s1943_s30, 1 }
  0x20   : > { %s1557_s26 = sshll.u32 %s407_s24, 3  ;;  %s2352_s1 = sld [smem:[#allocation16_spill]] }
  0x21   : > { %s1752_s20 = smul.u32 192, %s2085_s25  ;;  %s1719_s16 = sshll.u32 %s2085_s25, 4 }
  0x22   : > { %s1753_s22 = smul.u32 12, %s2085_s25  ;;  %s2353_s2 = sld [smem:[#allocation17_spill]] }
  0x23   : > { %s409_s19 = scalar_lea.vmem %s2351_s0, %s1557_s26  ;;  %s2111_s14 = scalar_lea.vmem %s2321_s4, %s1719_s16 }
  0x24   : > { %s2106_s24 = scalar_lea.vmem %s2320_s3, %s1753_s22  ;;  %s431_s11 = scalar_lea.vmem %s2322_s5, %s2085_s25 }
  0x25   : > { %s1721_s15 = sshll.u32 %s2085_s25, 5  ;;  %s1565_s21 = sshll.u32 %s2085_s25, 3 }
  0x26   : > { %s2096_s10 = scalar_lea.vmem %s2352_s1, %s1752_s20  ;;  %s2121_s29 = scalar_lea.vmem %s2323_s6, %s1721_s15 }
  0x27   : > { %s2127_s12 = scalar_lea.vmem %s2324_s7, %s1565_s21  ;;  %s405_s22 = scalar_lea.vmem [#allocation3], %s2080_s23 }
  0x28   : > { %s2101_s18 = scalar_lea.vmem %s2353_s2, %s1719_s16  ;;  %p1566_p0 = scmp.ne.s32.totalorder %s1943_s30, 0 }
  0x2a   : > { %445 = sbr.rel (%p1566_p0) target bundleno = 49 (0x31), region = 56 }
  0x2f   : > { %v446_v0 = vld [vmem:[%s409_s19] sm:$0xff]  ;;  %vm447_vm0 = vcmask 261120  }
  0x30   : > { %448 = vst.msk [vmem:[#allocation2] sm:$0xff] %vm447_vm0, %v446_v0 }
  0x31 PF: > { %vm451_vm1 = vcmask 261120   ;;  %v1961_v3 = vmov 32.0   ;;  %v1723_v15 = vld [vmem:[%s2096_s10 + $0x8] sm:$0xff]  ;;  %v1725_v16 = vld [vmem:[%s2096_s10 + $0x18] sm:$0xff]  ;;  %v1722_v19 = vld [vmem:[%s2096_s10] sm:$0xff]  ;;  %vm893_vm6 = vcmask 64512  }
  0x32   : > { %1839 = vrcp.f32 %v1961_v3  ;;  %v1727_v17 = vld [vmem:[%s2096_s10 + $0x28] sm:$0xff]  ;;  %v1729_v18 = vld [vmem:[%s2096_s10 + $0x38] sm:$0xff]  ;;  %603 = vmatpush.bf16.msra.mxu0 %v1723_v15  ;;  %628 = vmatpush.bf16.msra.mxu1 %v1725_v16  ;;  %v1724_v20 = vld [vmem:[%s2096_s10 + $0x10] sm:$0xff]  ;;  %vm1025_vm7 = vcmask 1043456   ;;  %vm1334_vm15 = vcmask 523264   ;;  %p1714_p1 = scmp.ne.s32.totalorder %s1943_s30, 1 }
  0x33   : > { %653 = vmatpush.bf16.msra.mxu2 %v1727_v17  ;;  %678 = vmatpush.bf16.msra.mxu3 %v1729_v18  ;;  %v1726_v21 = vld [vmem:[%s2096_s10 + $0x20] sm:$0xff]  ;;  %v1728_v22 = vld [vmem:[%s2096_s10 + $0x30] sm:$0xff]  ;;  %v1731_v24 = vld [vmem:[%s2096_s10 + $0x48] sm:$0xff] }
  0x34   : > { %v1733_v25 = vld [vmem:[%s2096_s10 + $0x58] sm:$0xff]  ;;  %v1735_v26 = vld [vmem:[%s2096_s10 + $0x68] sm:$0xff]  ;;  %v1730_v29 = vld [vmem:[%s2096_s10 + $0x40] sm:$0xff] }
  0x35   : > { %v1737_v28 = vld [vmem:[%s2096_s10 + $0x78] sm:$0xff]  ;;  %v1732_v30 = vld [vmem:[%s2096_s10 + $0x50] sm:$0xff]  ;;  %v1734_v32 = vld [vmem:[%s2096_s10 + $0x60] sm:$0xff] }
  0x36   : > { %604 = vmatpush.bf16.msra.mxu0 %v1722_v19  ;;  %629 = vmatpush.bf16.msra.mxu1 %v1724_v20  ;;  %v1736_v33 = vld [vmem:[%s2096_s10 + $0x70] sm:$0xff]  ;;  %v2158_v38 = vld [vmem:[%s2127_s12] sm:$0xff]  ;;  %v1739_v48 = vld [vmem:[%s2096_s10 + $0x88] sm:$0xff] }
  0x37   : > { %v2131_v1 = vld [vmem:[#allocation2] sm:$0xff]  ;;  %654 = vmatpush.bf16.msra.mxu2 %v1726_v21  ;;  %679 = vmatpush.bf16.msra.mxu3 %v1728_v22  ;;  %v481_v41 = vperm.slane %v2158_v38, 0  ;;  %v483_v44 = vperm.slane %v2158_v38, 1  ;;  %v1741_v49 = vld [vmem:[%s2096_s10 + $0x98] sm:$0xff]  ;;  %v1743_v50 = vld [vmem:[%s2096_s10 + $0xa8] sm:$0xff] }
  0x38   : > { %v452_v2 = vsel %vm451_vm1, %v2131_v1, 0.0  ;;  %v1840_v4 = vpop.eup %1839  ;;  %v1745_v51 = vld [vmem:[%s2096_s10 + $0xb8] sm:$0xff]  ;;  %v1738_v52 = vld [vmem:[%s2096_s10 + $0x80] sm:$0xff]  ;;  %v1740_v53 = vld [vmem:[%s2096_s10 + $0x90] sm:$0xff] }
  0x39   : > { %453 = vadd.xlane.f32.xlu0 %v452_v2  ;;  %v456_v5 = vmul.f32 32.0, %v1840_v4  ;;  %vm460_vm2 = vweird.f32 %v1840_v4  ;;  %v1742_v54 = vld [vmem:[%s2096_s10 + $0xa0] sm:$0xff]  ;;  %v1744_v55 = vld [vmem:[%s2096_s10 + $0xb0] sm:$0xff] }
  0x3a   : > { %703 = vmatpush.bf16.msrb.mxu0 %v1731_v24  ;;  %728 = vmatpush.bf16.msrb.mxu1 %v1733_v25  ;;  %v1830_v62 = vld [vmem:[%s2106_s24 + $0x4] ss:$0 sm:$0xff]  ;;  %v1831_v63 = vld [vmem:[%s2106_s24 + $0x5] ss:$0 sm:$0xff]  ;;  %v1828_v24 = vld [vmem:[%s2106_s24 + $0x2] ss:$0 sm:$0xff] }
  0x3b   : > { %v457_v6 = vsub.f32 1.0, %v456_v5  ;;  %753 = vmatpush.bf16.msrb.mxu2 %v1735_v26  ;;  %778 = vmatpush.bf16.msrb.mxu3 %v1737_v28  ;;  %v1829_v25 = vld [vmem:[%s2106_s24 + $0x3] ss:$0 sm:$0xff] }
  0x3d   : > { %v458_v7 = vmul.f32 %v1840_v4, %v457_v6 }
  0x3e   : > { %704 = vmatpush.bf16.msrb.mxu0 %v1730_v29  ;;  %729 = vmatpush.bf16.msrb.mxu1 %v1732_v30 }
  0x3f   : > { %v459_v8 = vadd.f32 %v1840_v4, %v458_v7  ;;  %754 = vmatpush.bf16.msrb.mxu2 %v1734_v32  ;;  %779 = vmatpush.bf16.msrb.mxu3 %v1736_v33  ;;  %v1826_v7 = vld [vmem:[%s2106_s24] ss:$0 sm:$0xff]  ;;  %v1834_v32 = vld [vmem:[%s2106_s24 + $0x8] ss:$0 sm:$0xff]  ;;  %v1835_v33 = vld [vmem:[%s2106_s24 + $0x9] ss:$0 sm:$0xff] }
  0x41   : > { %v2135_v9 = vsel %vm460_vm2, %v1840_v4, %v459_v8 }
  0xac   : > { %v454_v10 = vpop.xlane.xlu0 %453 }
  0xad   : > { %v462_v11 = vmul.f32 %v2135_v9, %v454_v10 }
  0xaf   : > { %v463_v12 = vsub.f32 %v2131_v1, %v462_v11  ;;  %v1827_v11 = vld [vmem:[%s2106_s24 + $0x1] ss:$0 sm:$0xff] }
  0xb1   : > { %v464_v13 = vmul.f32 %v463_v12, %v463_v12 }
  0xb3   : > { %v465_v14 = vsel %vm451_vm1, %v464_v13, 0.0  ;;  %v1833_v13 = vld [vmem:[%s2106_s24 + $0x7] ss:$0 sm:$0xff] }
  0xb4   : > { %466 = vadd.xlane.f32.xlu0 %v465_v14 }
 0x127   : > { %v467_v23 = vpop.xlane.xlu0 %466 }
 0x128   : > { %v468_v27 = vmul.f32 %v467_v23, %v2135_v9 }
 0x12a   : > { %v469_v31 = vadd.f32 1e-05, %v468_v27 }
 0x12c   : > { %1841 = vrsqrt.f32 %v469_v31  ;;  %vm476_vm4 = vweird.f32 %v469_v31 }
 0x132   : > { %v1842_v34 = vpop.eup %1841 }
 0x133   : > { %v471_v35 = vmul.f32 %v1842_v34, %v469_v31  ;;  %vm477_vm3 = vweird.f32 %v1842_v34 }
 0x134   : > { %vm478_vm5 = vmor %vm476_vm4, %vm477_vm3 }
 0x135   : > { %v472_v36 = vmul.f32 %v1842_v34, %v471_v35 }
 0x137   : > { %v473_v37 = vmul.f32 0.5, %v472_v36 }
 0x139   : > { %v474_v39 = vsub.f32 1.5, %v473_v37 }
 0x13b   : > { %v475_v40 = vmul.f32 %v1842_v34, %v474_v39 }
 0x13d   : > { %v479_v42 = vsel %vm478_vm5, %v1842_v34, %v475_v40 }
 0x13e   : > { %v480_v43 = vmul.f32 %v479_v42, %v463_v12  ;;  %v1832_v12 = vld [vmem:[%s2106_s24 + $0x6] ss:$0 sm:$0xff] }
 0x140   : > { %v482_v45 = vmul.f32 %v481_v41, %v480_v43 }
 0x142   : > { %v484_v46 = vadd.f32 %v483_v44, %v482_v45 }
 0x144   : > { %v485_v47 = vpack.c.bf16 %v484_v46, %v484_v46 }
 0x146   : > { %1575 = vmatmul.msk.bf16.vlgmr.msra.gmra.mxu0 %vm451_vm1, %v485_v47  ;;  %1584 = vmatmul.msk.bf16.vlgmr.msra.gmra.mxu1 %vm451_vm1, %v485_v47 }
 0x147   : > { %1593 = vmatmul.msk.bf16.vlgmr.msra.gmra.mxu2 %vm451_vm1, %v485_v47  ;;  %1602 = vmatmul.msk.bf16.vlgmr.msra.gmra.mxu3 %vm451_vm1, %v485_v47 }
 0x148   : > { %803 = vmatpush.bf16.msra.mxu0 %v1739_v48  ;;  %828 = vmatpush.bf16.msra.mxu1 %v1741_v49  ;;  %v1837_v48 = vld [vmem:[%s2106_s24 + $0xb] ss:$0 sm:$0xff] }
 0x149   : > { %853 = vmatpush.bf16.msra.mxu2 %v1743_v50  ;;  %878 = vmatpush.bf16.msra.mxu3 %v1745_v51 }
 0x14c   : > { %804 = vmatpush.bf16.msra.mxu0 %v1738_v52  ;;  %829 = vmatpush.bf16.msra.mxu1 %v1740_v53 }
 0x14d   : > { %854 = vmatpush.bf16.msra.mxu2 %v1742_v54  ;;  %879 = vmatpush.bf16.msra.mxu3 %v1744_v55 }
 0x156   : > { %1611 = vmatmul.msk.bf16.vlgmr.msrb.gmra.mxu0 %vm451_vm1, %v485_v47  ;;  %1620 = vmatmul.msk.bf16.vlgmr.msrb.gmra.mxu1 %vm451_vm1, %v485_v47 }
 0x157   : > { %1629 = vmatmul.msk.bf16.vlgmr.msrb.gmra.mxu2 %vm451_vm1, %v485_v47  ;;  %1638 = vmatmul.msk.bf16.vlgmr.msrb.gmra.mxu3 %vm451_vm1, %v485_v47 }
 0x166   : > { %1647 = vmatmul.msk.bf16.vlgmr.msra.gmra.mxu0 %vm451_vm1, %v485_v47  ;;  %1656 = vmatmul.msk.bf16.vlgmr.msra.gmra.mxu1 %vm451_vm1, %v485_v47 }
 0x167   : > { %1665 = vmatmul.msk.bf16.vlgmr.msra.gmra.mxu2 %vm451_vm1, %v485_v47  ;;  %1674 = vmatmul.msk.bf16.vlgmr.msra.gmra.mxu3 %vm451_vm1, %v485_v47  ;;  %v1836_v47 = vld [vmem:[%s2106_s24 + $0xa] ss:$0 sm:$0xff] }
 0x1c3   : > { %v606_v56 = vpop.f32.mrf.mxu0  ;;  %v631_v57 = vpop.f32.mrf.mxu1 }
 0x1c4   : > { %v607_v18 = vadd.f32 %v1826_v7, %v606_v56  ;;  %v632_v19 = vadd.f32 %v1827_v11, %v631_v57 }
 0x1c6   : > { %v885_v28 = vpack.c.bf16 %v607_v18, %v607_v18  ;;  %v886_v29 = vpack.c.bf16 %v632_v19, %v632_v19 }
 0x1ca   : > { %v656_v58 = vpop.f32.mrf.mxu2  ;;  %v681_v59 = vpop.f32.mrf.mxu3 }
 0x1cb   : > { %v608_v60 = vpop.f32.mrf.mxu0  ;;  %v633_v61 = vpop.f32.mrf.mxu1  ;;  %v657_v34 = vadd.f32 %v1828_v24, %v656_v58  ;;  %v682_v35 = vadd.f32 %v1829_v25, %v681_v59 }
 0x1cd   : > { %v887_v43 = vpack.c.bf16 %v657_v34, %v657_v34  ;;  %v888_v44 = vpack.c.bf16 %v682_v35, %v682_v35 }
 0x1d2   : > { %v658_v0 = vpop.f32.mrf.mxu2  ;;  %v683_v2 = vpop.f32.mrf.mxu3 }
 0x1d3   : > { %v706_v3 = vpop.f32.mrf.mxu0  ;;  %v731_v4 = vpop.f32.mrf.mxu1 }
 0x1d4   : > { %v707_v5 = vadd.f32 %v1830_v62, %v706_v3  ;;  %v732_v6 = vadd.f32 %v1831_v63, %v731_v4 }
 0x1d6   : > { %v889_v8 = vpack.c.bf16 %v707_v5, %v707_v5  ;;  %v890_v10 = vpack.c.bf16 %v732_v6, %v732_v6 }
 0x1d8   : > { %v898_v14 = vsel %vm893_vm6, %v889_v8, 0  ;;  %v917_v15 = vsel %vm893_vm6, %v890_v10, 0 }
 0x1d9   : > { %907 = vmatpush.bf16.xpose.msrb.mxu0 %v898_v14  ;;  %926 = vmatpush.bf16.xpose.msrb.mxu1 %v917_v15 }
 0x1da   : > { %v756_v16 = vpop.f32.mrf.mxu2  ;;  %v781_v17 = vpop.f32.mrf.mxu3 }
 0x1db   : > { %v757_v20 = vadd.f32 %v1832_v12, %v756_v16  ;;  %v782_v21 = vadd.f32 %v1833_v13, %v781_v17  ;;  %v708_v22 = vpop.f32.mrf.mxu0  ;;  %v733_v23 = vpop.f32.mrf.mxu1 }
 0x1dd   : > { %v891_v26 = vpack.c.bf16 %v757_v20, %v757_v20  ;;  %v892_v27 = vpack.c.bf16 %v782_v21, %v782_v21 }
 0x1df   : > { %v936_v30 = vsel %vm893_vm6, %v891_v26, 0  ;;  %v955_v31 = vsel %vm893_vm6, %v892_v27, 0 }
 0x1e0   : > { %945 = vmatpush.bf16.xpose.msrb.mxu2 %v936_v30  ;;  %964 = vmatpush.bf16.xpose.msrb.mxu3 %v955_v31 }
 0x1e1   : > { %1675 = vmatmul.msk.bf16.vlgmr.msrb.gmra.mxu0 %vm893_vm6, %v885_v28  ;;  %1676 = vmatmul.msk.bf16.vlgmr.msrb.gmra.mxu1 %vm893_vm6, %v886_v29 }
 0x1e2   : > { %v758_v36 = vpop.f32.mrf.mxu2  ;;  %v783_v37 = vpop.f32.mrf.mxu3 }
 0x1e3   : > { %v806_v39 = vpop.f32.mrf.mxu0  ;;  %v831_v40 = vpop.f32.mrf.mxu1 }
 0x1e4   : > { %v807_v41 = vadd.f32 %v1834_v32, %v806_v39  ;;  %v832_v42 = vadd.f32 %v1835_v33, %v831_v40 }
 0x1e6   : > { %v1018_v45 = vpack.c.bf16 %v807_v41, %v807_v41  ;;  %v1019_v46 = vpack.c.bf16 %v832_v42, %v832_v42 }
 0x1e7   : > { %1677 = vmatmul.msk.bf16.vlgmr.msrb.gmra.mxu2 %vm893_vm6, %v887_v43  ;;  %1678 = vmatmul.msk.bf16.vlgmr.msrb.gmra.mxu3 %vm893_vm6, %v888_v44 }
 0x1e8   : > { %v1027_v49 = vsel %vm1025_vm7, %v1018_v45, 0  ;;  %v1046_v50 = vsel %vm1025_vm7, %v1019_v46, 0 }
 0x1e9   : > { %1036 = vmatpush.bf16.msra.mxu0 %v1027_v49  ;;  %1055 = vmatpush.bf16.msra.mxu1 %v1046_v50  ;;  %v1103_v50 = vld [vmem:[%s2101_s18] sm:$0xf] }
 0x1ea   : > { %v856_v51 = vpop.f32.mrf.mxu2  ;;  %v881_v52 = vpop.f32.mrf.mxu3 }
 0x1eb   : > { %v857_v53 = vadd.f32 %v1836_v47, %v856_v51  ;;  %v882_v54 = vadd.f32 %v1837_v48, %v881_v52  ;;  %v808_v55 = vpop.f32.mrf.mxu0  ;;  %v833_v56 = vpop.f32.mrf.mxu1  ;;  %v1111_v51 = vsel %vm1025_vm7, %v1103_v50, 0  ;;  %v1105_v52 = vld [vmem:[%s2101_s18 + $0x8] sm:$0xf]  ;;  %v1838_v50 = vld [vmem:[%s431_s11] ss:$0 sm:$0xff] }
 0x1ec   : > { %v1106_v56 = vld [vmem:[%s2101_s18 + $0xc] sm:$0xf] }
 0x1ed   : > { %v1020_v57 = vpack.c.bf16 %v857_v53, %v857_v53  ;;  %v1021_v58 = vpack.c.bf16 %v882_v54, %v882_v54  ;;  %1120 = vmatpush.bf16.msrb.mxu0 %v1111_v51  ;;  %v1149_v53 = vsel %vm1025_vm7, %v1105_v52, 0  ;;  %v1104_v54 = vld [vmem:[%s2101_s18 + $0x4] sm:$0xf] }
 0x1ee   : > { %v1130_v55 = vsel %vm1025_vm7, %v1104_v54, 0 }
 0x1ef   : > { %v1065_v59 = vsel %vm1025_vm7, %v1020_v57, 0  ;;  %v1084_v60 = vsel %vm1025_vm7, %v1021_v58, 0  ;;  %1139 = vmatpush.bf16.msrb.mxu1 %v1130_v55  ;;  %v1168_v57 = vsel %vm1025_vm7, %v1106_v56, 0 }
 0x1f0   : > { %1074 = vmatpush.bf16.msra.mxu2 %v1065_v59  ;;  %1093 = vmatpush.bf16.msra.mxu3 %v1084_v60 }
 0x1f2   : > { %v858_v61 = vpop.f32.mrf.mxu2  ;;  %v883_v62 = vpop.f32.mrf.mxu3 }
 0x1f4   : > { %1158 = vmatpush.bf16.msrb.mxu2 %v1149_v53  ;;  %1177 = vmatpush.bf16.msrb.mxu3 %v1168_v57  ;;  %v1751_v57 = vld [vmem:[%s2121_s29 + $0x18] sm:$0xff] }
 0x25e   : > { %v909_v63 = vpop.f32.mrf.mxu0  ;;  %v928_v0 = vpop.f32.mrf.mxu1 }
 0x25f   : > { %v970_v2 = vsel %vm893_vm6, %v909_v63, -inf  ;;  %v973_v5 = vsel %vm893_vm6, %v928_v0, -inf }
 0x260   : > { %971 = vmax.xlane.f32.xlu2 %v970_v2 }
 0x266   : > { %v911_v3 = vpop.f32.mrf.mxu0  ;;  %v930_v4 = vpop.f32.mrf.mxu1 }
 0x268   : > { %974 = vmax.xlane.f32.xlu2 %v973_v5 }
 0x26a   : > { %v947_v6 = vpop.f32.mrf.mxu2  ;;  %v966_v7 = vpop.f32.mrf.mxu3 }
 0x26b   : > { %v976_v8 = vsel %vm893_vm6, %v947_v6, -inf  ;;  %v979_v12 = vsel %vm893_vm6, %v966_v7, -inf }
 0x26c   : > { %977 = vmax.xlane.f32.xlu1 %v976_v8 }
 0x272   : > { %v949_v10 = vpop.f32.mrf.mxu2  ;;  %v968_v11 = vpop.f32.mrf.mxu3 }
 0x274   : > { %980 = vmax.xlane.f32.xlu1 %v979_v12 }
 0x2d3   : > { %v972_v13 = vpop.xlane.xlu2 %971 }
 0x2d4   : > { %v982_v14 = vsub.f32 %v909_v63, %v972_v13 }
 0x2d6   : > { %v986_v15 = vmul.f32 1.442695, %v982_v14 }
 0x2d8   : > { %1843 = vpow2.f32 %v986_v15 }
 0x2db   : > { %v975_v17 = vpop.xlane.xlu2 %974 }
 0x2dc   : > { %v983_v21 = vsub.f32 %v928_v0, %v975_v17 }
 0x2de   : > { %v1844_v16 = vpop.eup %1843  ;;  %v988_v23 = vmul.f32 1.442695, %v983_v21 }
 0x2df   : > { %v978_v18 = vpop.xlane.xlu1 %977  ;;  %v994_v19 = vsel %vm893_vm6, %v1844_v16, 0.0 }
 0x2e0   : > { %v984_v20 = vsub.f32 %v947_v6, %v978_v18  ;;  %995 = vadd.xlane.f32.xlu2 %v994_v19 }
 0x2e2   : > { %v990_v22 = vmul.f32 1.442695, %v984_v20  ;;  %v1190_v20 = vperm.slane %v2158_v38, 4 }
 0x2e4   : > { %1845 = vpow2.f32 %v990_v22 }
 0x2e5   : > { %1847 = vpow2.f32 %v988_v23 }
 0x2e7   : > { %v981_v24 = vpop.xlane.xlu1 %980 }
 0x2e8   : > { %v985_v25 = vsub.f32 %v966_v7, %v981_v24 }
 0x2ea   : > { %v1846_v26 = vpop.eup %1845  ;;  %v992_v27 = vmul.f32 1.442695, %v985_v25 }
 0x2eb   : > { %v1000_v28 = vsel %vm893_vm6, %v1846_v26, 0.0  ;;  %v1848_v29 = vpop.eup %1847 }
 0x2ec   : > { %1849 = vpow2.f32 %v992_v27  ;;  %1001 = vadd.xlane.f32.xlu0 %v1000_v28  ;;  %v997_v32 = vsel %vm893_vm6, %v1848_v29, 0.0 }
 0x2f2   : > { %v1850_v30 = vpop.eup %1849 }
 0x2f3   : > { %v1003_v31 = vsel %vm893_vm6, %v1850_v30, 0.0 }
 0x2f4   : > { %1004 = vadd.xlane.f32.xlu1 %v1003_v31  ;;  %998 = vadd.xlane.f32.xlu0 %v997_v32  ;;  %v1747_v32 = vld [vmem:[%s2111_s14 + $0x8] sm:$0xff] }
 0x353   : > { %v996_v33 = vpop.xlane.xlu2 %995 }
 0x354   : > { %1851 = vrcp.f32 %v996_v33  ;;  %v1746_v33 = vld [vmem:[%s2111_s14] sm:$0xff] }
 0x35a   : > { %v1852_v34 = vpop.eup %1851 }
 0x35b   : > { %v1010_v35 = vmul.f32 %v1852_v34, %v1844_v16 }
 0x35d   : > { %v1014_v36 = vpack.c.bf16 %v1010_v35, %v1010_v35 }
 0x35f   : > { %v1002_v37 = vpop.xlane.xlu0 %1001  ;;  %1679 = vmatmul.msk.bf16.vlgmr.msra.gmra.mxu0 %vm893_vm6, %v1014_v36 }
 0x360   : > { %1853 = vrcp.f32 %v1002_v37  ;;  %1249 = vmatpush.bf16.msra.mxu0 %v1747_v32 }
 0x364   : > { %1250 = vmatpush.bf16.msra.mxu0 %v1746_v33 }
 0x366   : > { %v1854_v39 = vpop.eup %1853 }
 0x367   : > { %v1012_v40 = vmul.f32 %v1854_v39, %v1846_v26  ;;  %v1005_v41 = vpop.xlane.xlu1 %1004  ;;  %v999_v42 = vpop.xlane.xlu0 %998 }
 0x368   : > { %1855 = vrcp.f32 %v1005_v41 }
 0x369   : > { %v1016_v43 = vpack.c.bf16 %v1012_v40, %v1012_v40  ;;  %1857 = vrcp.f32 %v999_v42 }
 0x36b   : > { %1681 = vmatmul.msk.bf16.vlgmr.msra.gmra.mxu2 %vm893_vm6, %v1016_v43  ;;  %v1215_v43 = vperm.slane %v2158_v38, 2 }
 0x36e   : > { %v1856_v44 = vpop.eup %1855 }
 0x36f   : > { %v1858_v45 = vpop.eup %1857  ;;  %v1013_v46 = vmul.f32 %v1856_v44, %v1850_v30 }
 0x370   : > { %v1011_v47 = vmul.f32 %v1858_v45, %v1848_v29 }
 0x371   : > { %v1017_v48 = vpack.c.bf16 %v1013_v46, %v1013_v46  ;;  %v1217_v46 = vperm.slane %v2158_v38, 3 }
 0x372   : > { %v1015_v49 = vpack.c.bf16 %v1011_v47, %v1011_v47 }
 0x373   : > { %1682 = vmatmul.msk.bf16.vlgmr.msra.gmra.mxu3 %vm893_vm6, %v1017_v48 }
 0x374   : > { %1680 = vmatmul.msk.bf16.vlgmr.msra.gmra.mxu1 %vm893_vm6, %v1015_v49 }
 0x375   : > { %1342 = vmatpush.bf16.msra.mxu1 %v1751_v57 }
 0x3dc   : > { %v1038_v58 = vpop.f32.mrf.mxu0 }
 0x3dd   : > { %v1099_v59 = vpack.c.bf16 %v1038_v58, %v1038_v58 }
 0x3df   : > { %1683 = vmatmul.msk.bf16.vlgmr.msrb.gmra.mxu0 %vm893_vm6, %v1099_v59 }
 0x3e4   : > { %v1040_v60 = vpop.f32.mrf.mxu0 }
 0x3ee   : > { %v1076_v61 = vpop.f32.mrf.mxu2 }
 0x3ef   : > { %v1101_v62 = vpack.c.bf16 %v1076_v61, %v1076_v61 }
 0x3f1   : > { %v1057_v63 = vpop.f32.mrf.mxu1  ;;  %1685 = vmatmul.msk.bf16.vlgmr.msrb.gmra.mxu2 %vm893_vm6, %v1101_v62  ;;  %v1750_v62 = vld [vmem:[%s2121_s29 + $0x10] sm:$0xff] }
 0x3f2   : > { %v1100_v0 = vpack.c.bf16 %v1057_v63, %v1057_v63  ;;  %1343 = vmatpush.bf16.msra.mxu1 %v1750_v62 }
 0x3f4   : > { %1684 = vmatmul.msk.bf16.vlgmr.msrb.gmra.mxu1 %vm893_vm6, %v1100_v0 }
 0x3f6   : > { %v1078_v2 = vpop.f32.mrf.mxu2  ;;  %v1095_v3 = vpop.f32.mrf.mxu3 }
 0x3f7   : > { %v1102_v4 = vpack.c.bf16 %v1095_v3, %v1095_v3 }
 0x3f9   : > { %v1059_v5 = vpop.f32.mrf.mxu1  ;;  %1686 = vmatmul.msk.bf16.vlgmr.msrb.gmra.mxu3 %vm893_vm6, %v1102_v4  ;;  %v1749_v4 = vld [vmem:[%s2121_s29 + $0x8] sm:$0xff] }
 0x3fa   : > { %1344 = vmatpush.bf16.msra.mxu1 %v1749_v4 }
 0x3fe   : > { %v1097_v6 = vpop.f32.mrf.mxu3 }
 0x45c   : > { %v1122_v7 = vpop.f32.mrf.mxu0 }
 0x45d   : > { %v1183_v13 = vsel %vm451_vm1, %v1122_v7, 0.0 }
 0x464   : > { %v1124_v8 = vpop.f32.mrf.mxu0 }
 0x465   : > { %v1748_v8 = vld [vmem:[%s2121_s29] sm:$0xff] }
 0x466   : > { %1345 = vmatpush.bf16.msra.mxu1 %v1748_v8 }
 0x471   : > { %v1141_v10 = vpop.f32.mrf.mxu1 }
 0x472   : > { %v1184_v12 = vsel %vm451_vm1, %v1141_v10, 0.0 }
 0x473   : > { %v1185_v16 = vadd.f32 %v1184_v12, %v1183_v13 }
 0x474   : > { %v1160_v11 = vpop.f32.mrf.mxu2 }
 0x475   : > { %v1186_v14 = vsel %vm451_vm1, %v1160_v11, 0.0 }
 0x476   : > { %v1187_v17 = vadd.f32 %v1186_v14, %v1185_v16 }
 0x479   : > { %v1143_v15 = vpop.f32.mrf.mxu1 }
 0x47c   : > { %v1162_v18 = vpop.f32.mrf.mxu2  ;;  %v1179_v19 = vpop.f32.mrf.mxu3 }
 0x47d   : > { %v1188_v21 = vsel %vm451_vm1, %v1179_v19, 0.0 }
 0x47e   : > { %v1189_v22 = vadd.f32 %v1188_v21, %v1187_v17 }
 0x480   : > { %v1191_v23 = vadd.f32 %v1190_v20, %v1189_v22 }
 0x482   : > { %v2236_v24 = vadd.f32 %v1191_v23, %v2131_v1 }
 0x484   : > { %v1181_v25 = vpop.f32.mrf.mxu3  ;;  %v1193_v26 = vsel %vm451_vm1, %v2236_v24, 0.0 }
 0x485   : > { %1194 = vadd.xlane.f32.xlu1 %v1193_v26 }
 0x4f8   : > { %v1195_v27 = vpop.xlane.xlu1 %1194 }
 0x4f9   : > { %v1196_v28 = vmul.f32 %v1195_v27, %v2135_v9 }
 0x4fb   : > { %v1197_v29 = vsub.f32 %v2236_v24, %v1196_v28 }
 0x4fd   : > { %v1198_v30 = vmul.f32 %v1197_v29, %v1197_v29 }
 0x4ff   : > { %v1199_v31 = vsel %vm451_vm1, %v1198_v30, 0.0 }
 0x500   : > { %1200 = vadd.xlane.f32.xlu2 %v1199_v31 }
 0x573   : > { %v1201_v1 = vpop.xlane.xlu2 %1200 }
 0x574   : > { %v1202_v34 = vmul.f32 %v1201_v1, %v2135_v9 }
 0x576   : > { %v1203_v35 = vadd.f32 1e-05, %v1202_v34 }
 0x578   : > { %1859 = vrsqrt.f32 %v1203_v35  ;;  %vm1210_vm9 = vweird.f32 %v1203_v35 }
 0x57e   : > { %v1860_v36 = vpop.eup %1859 }
 0x57f   : > { %v1205_v37 = vmul.f32 %v1860_v36, %v1203_v35  ;;  %vm1211_vm8 = vweird.f32 %v1860_v36 }
 0x580   : > { %vm1212_vm10 = vmor %vm1210_vm9, %vm1211_vm8 }
 0x581   : > { %v1206_v39 = vmul.f32 %v1860_v36, %v1205_v37 }
 0x583   : > { %v1207_v40 = vmul.f32 0.5, %v1206_v39 }
 0x585   : > { %v1208_v41 = vsub.f32 1.5, %v1207_v40 }
 0x587   : > { %v1209_v42 = vmul.f32 %v1860_v36, %v1208_v41 }
 0x589   : > { %v1213_v44 = vsel %vm1212_vm10, %v1860_v36, %v1209_v42  ;;  %v1309_v36 = vperm.slane %v2158_v38, 5 }
 0x58a   : > { %v1214_v45 = vmul.f32 %v1213_v44, %v1197_v29 }
 0x58c   : > { %v1216_v47 = vmul.f32 %v1215_v43, %v1214_v45 }
 0x58e   : > { %v1218_v48 = vadd.f32 %v1217_v46, %v1216_v47 }
 0x590   : > { %v1219_v49 = vpack.c.bf16 %v1218_v48, %v1218_v48 }
 0x592   : > { %1695 = vmatmul.msk.bf16.vlgmr.msra.gmra.mxu0 %vm451_vm1, %v1219_v49 }
 0x60f   : > { %v1252_v51 = vpop.f32.mrf.mxu0 }
 0x610   : > { %v1253_v52 = vadd.f32 %v1838_v50, %v1252_v51 }
 0x612   : > { %v1257_v53 = vmul.f32 0.70710677, %v1253_v52  ;;  %v1256_v33 = vmul.f32 0.5, %v1253_v52 }
 0x614   : > { %v1258_v54 = vmul.f32 %v1257_v53, %v1257_v53 }
 0x616   : > { %v1259_v55 = vmin.f32 %v1258_v54, 16.0 }
 0x617   : > { %v1254_v56 = vpop.f32.mrf.mxu0 }
 0x618   : > { %v1260_v58 = vmul.f32 2.1237322e-06, %v1259_v55  ;;  %v1271_v59 = vmul.f32 3.8918573e-05, %v1259_v55 }
 0x61a   : > { %v1261_v60 = vadd.f32 0.00028619796, %v1260_v58  ;;  %v1272_v61 = vadd.f32 0.001143296, %v1271_v59 }
 0x61c   : > { %v1262_v63 = vmul.f32 %v1261_v60, %v1259_v55  ;;  %v1273_v0 = vmul.f32 %v1272_v61, %v1259_v55 }
 0x61e   : > { %v1274_v2 = vadd.f32 0.014752088, %v1273_v0  ;;  %v1263_v3 = vadd.f32 0.0036580483, %v1262_v63 }
 0x620   : > { %v1275_v5 = vmul.f32 %v1274_v2, %v1259_v55  ;;  %v1264_v7 = vmul.f32 %v1263_v3, %v1259_v55 }
 0x622   : > { %v1276_v6 = vadd.f32 0.112945676, %v1275_v5  ;;  %v1265_v12 = vadd.f32 0.05243302, %v1264_v7 }
 0x624   : > { %v1277_v10 = vmul.f32 %v1276_v6, %v1259_v55  ;;  %v1266_v15 = vmul.f32 %v1265_v12, %v1259_v55 }
 0x626   : > { %v1278_v11 = vadd.f32 0.4994258, %v1277_v10  ;;  %v1267_v16 = vadd.f32 0.18741608, %v1266_v15 }
 0x628   : > { %v1279_v13 = vmul.f32 %v1278_v11, %v1259_v55  ;;  %v1268_v18 = vmul.f32 %v1267_v16, %v1259_v55 }
 0x62a   : > { %v1280_v14 = vadd.f32 1.0, %v1279_v13  ;;  %v1269_v22 = vadd.f32 1.1283791, %v1268_v18 }
 0x62c   : > { %1861 = vrcp.f32 %v1280_v14  ;;  %v1292_v21 = vand.u32 2147483648, %v1280_v14  ;;  %v1290_v25 = vand.u32 2147483647, %v1280_v14  ;;  %vm1286_vm12 = vweird.f32 %v1280_v14 }
 0x62d   : > { %v1270_v28 = vmul.f32 %v1269_v22, %v1257_v53 }
 0x62e   : > { %v1293_v27 = vor.u32 1.1754944e-38, %v1292_v21  ;;  %vm1291_vm14 = vcmp.eq.f32.partialorder %v1290_v25, 8.507059e+37 }
 0x632   : > { %v1862_v17 = vpop.eup %1861 }
 0x633   : > { %v1282_v19 = vmul.f32 %v1862_v17, %v1280_v14  ;;  %vm1287_vm11 = vweird.f32 %v1862_v17 }
 0x634   : > { %vm1288_vm13 = vmor %vm1286_vm12, %vm1287_vm11 }
 0x635   : > { %v1283_v20 = vsub.f32 1.0, %v1282_v19 }
 0x637   : > { %v1284_v23 = vmul.f32 %v1862_v17, %v1283_v20 }
 0x639   : > { %v1285_v26 = vadd.f32 %v1862_v17, %v1284_v23 }
 0x63b   : > { %v1289_v29 = vsel %vm1288_vm13, %v1862_v17, %v1285_v26 }
 0x63c   : > { %v1294_v30 = vsel %vm1291_vm14, %v1293_v27, %v1289_v29 }
 0x63d   : > { %v1295_v31 = vmul.f32 %v1294_v30, %v1270_v28 }
 0x63f   : > { %v1696_v32 = vclamps-f32 %v1295_v31, 1.0 }
 0x641   : > { %v1298_v1 = vadd.f32 1.0, %v1696_v32 }
 0x643   : > { %v1299_v34 = vmul.f32 %v1298_v1, %v1256_v33 }
 0x645   : > { %v1300_v35 = vpack.c.bf16 %v1299_v34, %v1299_v34 }
 0x647   : > { %1713 = vmatmul.msk.bf16.vlgmr.msra.gmra.mxu1 %vm1334_vm15, %v1300_v35 }
 0x6c4   : > { %v1347_v37 = vpop.f32.mrf.mxu1 }
 0x6c5   : > { %v1348_v39 = vadd.f32 %v1347_v37, %v1309_v36 }
 0x6c7   : > { %v1351_v40 = vadd.f32 %v1348_v39, %v2236_v24 }
 0x6c8   : > { %1356 = sbr.rel (%p1714_p1) target bundleno = 2010 (0x7da), region = 60 }
 0x6c9   : > { %1352 = vst.msk [vmem:[#allocation2] sm:$0xff] %vm451_vm1, %v1351_v40 }
 0x6cc   : > { %v1349_v41 = vpop.f32.mrf.mxu1 }
 0x6cd   : > { %v1357_v42 = vsel %vm451_vm1, %v1351_v40, 0.0  ;;  %v1379_v56 = vperm.slane %v2158_v38, 6  ;;  %v1381_v58 = vperm.slane %v2158_v38, 7 }
 0x6ce   : > { %1358 = vadd.xlane.f32.xlu0 %v1357_v42 }
 0x741   : > { %v1359_v43 = vpop.xlane.xlu0 %1358 }
 0x742   : > { %v1360_v44 = vmul.f32 %v1359_v43, %v2135_v9 }
 0x744   : > { %v1361_v45 = vsub.f32 %v1351_v40, %v1360_v44 }
 0x746   : > { %v1362_v46 = vmul.f32 %v1361_v45, %v1361_v45 }
 0x748   : > { %v1363_v47 = vsel %vm451_vm1, %v1362_v46, 0.0 }
 0x749   : > { %1364 = vadd.xlane.f32.xlu0 %v1363_v47 }
 0x7bc   : > { %v1365_v48 = vpop.xlane.xlu0 %1364 }
 0x7bd   : > { %v1366_v24 = vmul.f32 %v1365_v48, %v2135_v9 }
 0x7bf   : > { %v1367_v49 = vadd.f32 1e-05, %v1366_v24 }
 0x7c1   : > { %1863 = vrsqrt.f32 %v1367_v49  ;;  %vm1374_vm2 = vweird.f32 %v1367_v49 }
 0x7c7   : > { %v1864_v50 = vpop.eup %1863 }
 0x7c8   : > { %v1369_v51 = vmul.f32 %v1864_v50, %v1367_v49  ;;  %vm1375_vm0 = vweird.f32 %v1864_v50 }
 0x7c9   : > { %vm1376_vm3 = vmor %vm1374_vm2, %vm1375_vm0 }
 0x7ca   : > { %v1370_v52 = vmul.f32 %v1864_v50, %v1369_v51 }
 0x7cc   : > { %v1371_v53 = vmul.f32 0.5, %v1370_v52 }
 0x7ce   : > { %v1372_v54 = vsub.f32 1.5, %v1371_v53 }
 0x7d0   : > { %v1373_v55 = vmul.f32 %v1864_v50, %v1372_v54 }
 0x7d2   : > { %v1377_v57 = vsel %vm1376_vm3, %v1864_v50, %v1373_v55 }
 0x7d3   : > { %v1378_v59 = vmul.f32 %v1377_v57, %v1361_v45 }
 0x7d5   : > { %v1380_v60 = vmul.f32 %v1379_v56, %v1378_v59 }
 0x7d7   : > { %v1382_v9 = vadd.f32 %v1381_v58, %v1380_v60 }
 0x7d9   : > { %1383 = vst.msk [vmem:[%s405_s22] sm:$0xff] %vm451_vm1, %v1382_v9 }
 0x7da PF: > { %s1716_s2 = sshll.u32 %s1947_s9, 3  ;;  %s2354_s10 = sld [smem:[#allocation18_spill]] }
 0x7db   : > { %s1397_s25 = sshll.u32 %s405_s22, 4  ;;  %s2356_s24 = sand.u32 1, %s1935_s28   ;;  %s1398_s25 = int_to_ptr.vmem [resolvable:$true] %s1397_s25 }
 0x7dc   : > { %s1385_s13 = scalar_lea.sflag [#allocation4], %s2356_s24 }
 0x7e0   : > { %s2355_s16 = smov %s2354_s10  ;;  %s1395_s18 = scalar_lea.hbm %s2354_s10, %s1716_s2 }
 0x7e1   : > { %s1399_s19 = sshll.u32 %s1395_s18, 4  ;;  %s1885_s15 = scalar_lea.hbm %s2355_s16, 16  ;;  %s1400_s19 = int_to_ptr.hbm [resolvable:$true] %s1399_s19 }
 0x7e2   : > { %s1879_s26 = sshra.s32 %s1400_s19, 4  ;;  %s1880_s26 = int_to_ptr.hbm [resolvable:$true] %s1879_s26 }
 0x7e3   : > { %s1881_s14 = scalar_lea.hbm %s1880_s26, 8  ;;  %p1886_p6 = scmp.lt.s32.totalorder %s1880_s26, %s2355_s16 }
 0x7e4   : > { %p1882_p2 = scmp.ne.s32.totalorder %s1880_s26, %s1881_s14  ;;  %p1887_p7 = scmp.lt.s32.totalorder %s1885_s15, %s1881_s14 }
 0x7e6   : > { %p1883_p4 = pnand %p1882_p2, %p2056_p3  ;;  %p1888_p8 = por %p1887_p7, %p1886_p6 }
 0x7e8   : > { %p1884_p5 = pneg %p1883_p4 }
 0x7ea   : > { %p1889_p10 = pnand %p1888_p8, %p1884_p5 }
 0x7ec   : > { %1892 = shalt.err (!%p1889_p10)
}
 0x7ed   : > { %1754 = dma.vmem_to_hbm [thread:$0]  (%p2056_p3), %s1398_s25, 128, %s1400_s19, %s1385_s13  }
 0x7ee PF: > { %s2357_s23 = sld [smem:[#allocation10_spill]] }
 0x7ef   : > { %s2358_s21 = sld [smem:[#allocation6_spill]] }
 0x7f4   : > { %p1760_p11 = scmp.ge.s32.totalorder %s2357_s23, 2 }
 0x7f5   : > { %s1411_s12 = sand.u32 1, %s2358_s21  }
 0x7f6   : > { %p1757_p12 = pnand %p1760_p11, %p2066_p9  ;;  %s1412_s22 = scalar_lea.sflag [#allocation4], %s1411_s12 }
 0x7f8   : > { %p1758_p13 = pneg %p1757_p12 }
 0x7fa   : > { %1926 = dma.done.wait (%p1758_p13), %s1412_s22, 128  }
 0x7fb   : > { %1928 = vsyncadd (%p1758_p13), %s1412_s22, 4294967168  ;;  %s21_s12 = sadd.s32 1, %s2357_s23   ;;  %s2360_s0 = sld [smem:[#allocation7_spill]] }
 0x7fc   : > { %p18_p0 = scmp.ge.s32.totalorder %s21_s12, 6   ;;  %s2361_s29 = sld [smem:[#allocation14_spill]] }
 0x7fd   : > { %s2362_s30 = sld [smem:[#allocation8_spill]]  ;;  %s2366_s27 = smov %s1935_s28 }
 0x7fe   : > { %s2363_s9 = sld [smem:[#allocation9_spill]]  ;;  %20 = sbr.rel (!%p18_p0) target bundleno = 10 (0xa), region = 116 }
 0x7ff   : > { %s2364_s10 = sld [smem:[#allocation11_spill]] }
 0x800   : > { %s2365_s11 = sld [smem:[#allocation12_spill]] }
 0x801   : > { %s2367_s28 = smov %s2360_s0 }
 0x803   :  { %1418 = vsyncpa [#allocation4], 1 }
 0x804   :  { %1420 = vsyncpa [#allocation4 + $0x1], 1 }

</bundles_post_ra>
